<compile_context>
chip_gen: v6e
topology: v6e:2x2x1
jax: 0.10.0
libtpu: 0.0.40
codegen_flags: <defaults>
</compile_context>

<pallas_src>
import functools

import jax
import jax.numpy as jnp
from jax.experimental import pallas as pl
from jax.experimental.pallas import tpu as pltpu


# --------------------------------------------------------------------------- #
# Kernel
# --------------------------------------------------------------------------- #
def gaze2screen_kernel(x_ref, w_ref, b_ref, o_ref):
    # x_ref: (tr, 128)  -- 16 samples per row, 8 features each (lane-dense)
    # w_ref: (128, 32)  -- block-diagonal folded weight (16 x W_eff^T on diag)
    # b_ref: (1, 32)    -- folded bias tiled 16x
    # o_ref: (tr, 32)   -- 16 samples per row, 2 outputs each
    y = jnp.dot(x_ref[...], w_ref[...], preferred_element_type=jnp.float32)
    o_ref[...] = (y + b_ref[...]).astype(o_ref.dtype)


# --------------------------------------------------------------------------- #
# Parameter folding
# --------------------------------------------------------------------------- #
def _round_up(n, m):
    return ((n + m - 1) // m) * m


def fold_params(params):
    """Fold the 5 affine layers (PyTorch Linear convention, W: (out,in)) into one."""
    w = params["w_in"].astype(jnp.float32)
    b = params["b_in"].astype(jnp.float32)
    for wk, bk in (("w0", "b0"), ("w1", "b1"), ("w2", "b2"), ("w_out", "b_out")):
        wl = params[wk].astype(jnp.float32)
        b = wl @ b + params[bk].astype(jnp.float32)
        w = wl @ w
    return w, b  # (2, 8), (2,)


def make_block_diag_params(params):
    """Build the (128, 32) block-diagonal weight and (1, 32) tiled bias.

    With x viewed as (B/16, 128) (16 samples of 8 features per row), a single
    dot with this weight computes all 16 samples' (2,) outputs per row.
    """
    w_eff, b_eff = fold_params(params)                    # (2, 8), (2,)
    eye16 = jnp.eye(16, dtype=jnp.float32)
    # w_blk[8*i + k, 2*j + o] = eye[i, j] * W_eff^T[k, o]
    w_blk = jnp.einsum("ij,ko->ikjo", eye16, w_eff.T).reshape(128, 32)
    b_blk = jnp.tile(b_eff, 16).reshape(1, 32)
    return w_eff, b_eff, w_blk, b_blk


# --------------------------------------------------------------------------- #
# Forward wrapper
# --------------------------------------------------------------------------- #
def gaze2screen_forward(x, params, *, block_rows=16384, min_pallas_batch=4096):
    """x: (B, 8) float32 -> (B, 2) float32."""
    B, F = x.shape
    assert F == 8

    w_eff, b_eff, w_blk, b_blk = make_block_diag_params(params)

    if B == 0:
        return jnp.zeros((0, 2), dtype=jnp.float32)

    # Tiny-batch fast path: pallas_call fixed overhead dominates -> plain XLA.
    if B < min_pallas_batch:
        return (x.astype(jnp.float32) @ w_eff.T + b_eff).astype(jnp.float32)

    x = x.astype(jnp.float32)

    # Pad rows only up to the next multiple of 16 (no-op for typical batches);
    # everything else (ragged tiles) is handled by Pallas block masking.
    pad = (-B) % 16
    if pad:
        x = jnp.pad(x, ((0, pad), (0, 0)))
    Bp = B + pad
    R = Bp // 16

    # Zero-copy, lane-dense view: (Bp, 8) f32 is bit-identical to (R, 128).
    x_view = x.reshape(R, 128)

    # Row-tile size: multiple of 8 sublanes, capped by the (padded) row count.
    tr = _round_up(min(block_rows, _round_up(R, 8)), 8)
    grid = (pl.cdiv(R, tr),)

    # Advisory cost for XLA scheduling around the custom call.
    cost = pl.CostEstimate(
        flops=2 * R * 128 * 32,
        bytes_accessed=R * 128 * 4 + R * 32 * 4 + 128 * 32 * 4 + 32 * 4,
        transcendentals=0,
    )

    out = pl.pallas_call(
        gaze2screen_kernel,
        out_shape=jax.ShapeDtypeStruct((R, 32), jnp.float32),
        grid=grid,
        in_specs=[
            pl.BlockSpec((tr, 128), lambda i: (i, 0)),  # streamed input tile
            pl.BlockSpec((128, 32), lambda i: (0, 0)),  # resident folded weight
            pl.BlockSpec((1, 32), lambda i: (0, 0)),    # resident folded bias
        ],
        out_specs=pl.BlockSpec((tr, 32), lambda i: (i, 0)),
        compiler_params=pltpu.CompilerParams(
            dimension_semantics=("parallel",),          # shard batch across TCs (v7x)
            vmem_limit_bytes=48 * 1024 * 1024,          # covers 2x double-buffered tiles
        ),
        cost_estimate=cost,
    )(x_view, w_blk, b_blk)

    # (R, 32) is exactly (Bp, 2) reshaped (free); slice only if we padded.
    out = out.reshape(Bp, 2)
    if pad:
        out = out[:B]
    return out


# --------------------------------------------------------------------------- #
# Init / reference
# --------------------------------------------------------------------------- #
def init_params(key):
    """Deterministic init matching nn.Linear shapes (weight: (out, in), bias: (out,))."""
    def linear_init(k, out_f, in_f):
        kw, kb = jax.random.split(k)
        bound = 1.0 / jnp.sqrt(in_f)
        w = jax.random.uniform(kw, (out_f, in_f), jnp.float32, -bound, bound)
        b = jax.random.uniform(kb, (out_f,), jnp.float32, -bound, bound)
        return w, b

    keys = jax.random.split(key, 5)
    w_in, b_in = linear_init(keys[0], 8, 8)
    w0, b0 = linear_init(keys[1], 8, 8)
    w1, b1 = linear_init(keys[2], 8, 8)
    w2, b2 = linear_init(keys[3], 8, 8)
    w_out, b_out = linear_init(keys[4], 2, 8)
    return dict(w_in=w_in, b_in=b_in, w0=w0, b0=b0, w1=w1, b1=b1,
                w2=w2, b2=b2, w_out=w_out, b_out=b_out)


def reference_forward(x, p):
    h = x @ p["w_in"].T + p["b_in"]
    h = h @ p["w0"].T + p["b0"]
    h = h @ p["w1"].T + p["b1"]
    h = h @ p["w2"].T + p["b2"]
    return h @ p["w_out"].T + p["b_out"]


# --------------------------------------------------------------------------- #
# Demo / self-test
# --------------------------------------------------------------------------- #
if __name__ == "__main__":
    key = jax.random.PRNGKey(0)
    kx, kp = jax.random.split(key)
    params = init_params(kp)

    # 1) Kernel path (forced), batch a multiple of 16 -> pure zero-copy reshapes.
    B = 48
    x = jax.random.normal(kx, (B, 8), dtype=jnp.float32)
    out = jax.block_until_ready(gaze2screen_forward(x, params, min_pallas_batch=0))
    ref = reference_forward(x, params)
    assert out.shape == (B, 2)
    assert jnp.allclose(out, ref, atol=1e-5, rtol=1e-5)

    # 2) Kernel path with a ragged batch (pads only to the next multiple of 16).
    B2 = 21
    x2 = jax.random.normal(jax.random.PRNGKey(1), (B2, 8), dtype=jnp.float32)
    out2 = jax.block_until_ready(gaze2screen_forward(x2, params, min_pallas_batch=0))
    assert out2.shape == (B2, 2)
    assert jnp.allclose(out2, reference_forward(x2, params), atol=1e-5, rtol=1e-5)

    # 3) Tiny-batch fast path (plain XLA, default threshold).
    out3 = jax.block_until_ready(gaze2screen_forward(x, params))
    assert jnp.allclose(out3, ref, atol=1e-5, rtol=1e-5)

    print("KERNEL_OK")
</pallas_src>

<mosaic_0001>
module attributes {stable_mosaic.version = 11 : i64} {
  func.func @gaze2screen_kernel(%arg0: i32, %arg1: memref<8x128xf32, #tpu.memory_space<vmem>>, %arg2: memref<128x32xf32, #tpu.memory_space<vmem>>, %arg3: memref<1x32xf32, #tpu.memory_space<vmem>>, %arg4: memref<8x32xf32, #tpu.memory_space<vmem>>) attributes {dimension_semantics = [#tpu.dimension_semantics<parallel>], iteration_bounds = array<i64: 1>, scalar_prefetch = 0 : i64, scratch_operands = 0 : i64, tpu.core_type = #tpu.core_type<tc>, window_params = [{transform_indices = @transform_0, window_bounds = array<i64: 8, 128>}, {pipeline_mode = #tpu.pipeline_mode<synchronous>, transform_indices = @transform_1, window_bounds = array<i64: 128, 32>}, {pipeline_mode = #tpu.pipeline_mode<synchronous>, transform_indices = @transform_2, window_bounds = array<i64: 1, 32>}, {transform_indices = @transform_3, window_bounds = array<i64: 8, 32>}]} {
    %c0 = arith.constant 0 : index
    %c0_0 = arith.constant 0 : index
    %0 = vector.load %arg1[%c0, %c0_0] : memref<8x128xf32, #tpu.memory_space<vmem>>, vector<8x128xf32>
    %c0_1 = arith.constant 0 : index
    %c0_2 = arith.constant 0 : index
    %1 = vector.load %arg2[%c0_1, %c0_2] : memref<128x32xf32, #tpu.memory_space<vmem>>, vector<128x32xf32>
    %cst = arith.constant dense<0.000000e+00> : vector<8x32xf32>
    %2 = tpu.matmul %0, %1, %cst {dimension_numbers = #tpu.dot_dimension_numbers<[1], [0], [0], [1], [0, 0, 1, 1], [], []>} : vector<8x128xf32>, vector<128x32xf32>, vector<8x32xf32> -> vector<8x32xf32>
    %c0_3 = arith.constant 0 : index
    %c0_4 = arith.constant 0 : index
    %3 = vector.load %arg3[%c0_3, %c0_4] : memref<1x32xf32, #tpu.memory_space<vmem>>, vector<1x32xf32>
    %4 = vector.broadcast %3 : vector<1x32xf32> to vector<8x32xf32>
    %5 = arith.addf %2, %4 : vector<8x32xf32>
    %c0_5 = arith.constant 0 : index
    %c0_6 = arith.constant 0 : index
    %6 = vector.load %arg4[%c0_5, %c0_6] : memref<8x32xf32, #tpu.memory_space<vmem>>, vector<8x32xf32>
    tpu.vector_store %arg4[%c0_5, %c0_6], %5 {strides = array<i32>} : memref<8x32xf32, #tpu.memory_space<vmem>>, vector<8x32xf32>,
    return
  }
  func.func @transform_0(%arg0: i32) -> (i32, i32) {
    %c0_i32 = arith.constant 0 : i32
    %c0_i32_0 = arith.constant 0 : i32
    return %arg0, %c0_i32 : i32, i32
  }
  func.func @transform_1(%arg0: i32) -> (i32, i32) {
    %c0_i32 = arith.constant 0 : i32
    %c0_i32_0 = arith.constant 0 : i32
    %c0_i32_1 = arith.constant 0 : i32
    return %c0_i32, %c0_i32_0 : i32, i32
  }
  func.func @transform_2(%arg0: i32) -> (i32, i32) {
    %c0_i32 = arith.constant 0 : i32
    %c0_i32_0 = arith.constant 0 : i32
    %c0_i32_1 = arith.constant 0 : i32
    return %c0_i32, %c0_i32_0 : i32, i32
  }
  func.func @transform_3(%arg0: i32) -> (i32, i32) {
    %c0_i32 = arith.constant 0 : i32
    %c0_i32_0 = arith.constant 0 : i32
    return %arg0, %c0_i32 : i32, i32
  }
}

</mosaic_0001>

<bundles_post_ra>
// kernel: tpu_custom_call.1
= control target key start
LH: loop header
LB: loop body
LE: loop exit
PB: predicated region body
PF: predicated region fallthrough
CT: control target
= control target key end

     0   :  { %8 = vsyncpa [#allocation3], 0  ;;  %v207_v1 = vmov 0.0   ;;  %vm208_vm0 = vmmov 0   ;;  %vm109_vm1 = vcmask 261120   ;;  %s289_s0 = inlined_call_operand.vmem [shape: f32[3,128], index: 0, kind: input, shape index: {}]   ;;  %s290_s1 = inlined_call_operand.vmem [shape: f32[128,32], index: 1, kind: input, shape index: {}]   ;;  %s291_s2 = inlined_call_operand.vmem [shape: f32[1,32], index: 2, kind: input, shape index: {}]   ;;  %s292_s3 = inlined_call_operand.hbm [shape: f32[3,32], index: 3, kind: output, shape index: {}]  }
   0x1   :  { %v31_v0 = vld [vmem:[%s290_s1 + $0x78] sm:$0xff]  ;;  %145 = vmatprep.subr.mxu0 %v207_v1  ;;  %v30_v2 = vld [vmem:[%s290_s1 + $0x70] sm:$0xff]  ;;  %177 = vmatprep.mubr.msk.f32.mxu0 %vm208_vm0, %v207_v1  ;;  %v29_v3 = vld [vmem:[%s290_s1 + $0x68] sm:$0xff] }
   0x2   :  { %146 = vmatpush3.msra.mxu0 %v31_v0  ;;  %v28_v4 = vld [vmem:[%s290_s1 + $0x60] sm:$0xff]  ;;  %v27_v5 = vld [vmem:[%s290_s1 + $0x58] sm:$0xff]  ;;  %v26_v6 = vld [vmem:[%s290_s1 + $0x50] sm:$0xff] }
   0x3   :  { %147 = vmatprep.subr.mxu0 %v207_v1  ;;  %v25_v7 = vld [vmem:[%s290_s1 + $0x48] sm:$0xff]  ;;  %v24_v8 = vld [vmem:[%s290_s1 + $0x40] sm:$0xff]  ;;  %v23_v9 = vld [vmem:[%s290_s1 + $0x38] sm:$0xff] }
   0x4   :  { %148 = vmatpush3.msra.mxu0 %v30_v2  ;;  %v22_v10 = vld [vmem:[%s290_s1 + $0x30] sm:$0xff]  ;;  %v21_v11 = vld [vmem:[%s290_s1 + $0x28] sm:$0xff]  ;;  %v20_v12 = vld [vmem:[%s290_s1 + $0x20] sm:$0xff] }
   0x5   :  { %149 = vmatprep.subr.mxu0 %v207_v1  ;;  %v19_v13 = vld [vmem:[%s290_s1 + $0x18] sm:$0xff]  ;;  %v18_v14 = vld [vmem:[%s290_s1 + $0x10] sm:$0xff]  ;;  %v17_v15 = vld [vmem:[%s290_s1 + $0x8] sm:$0xff] }
   0x6   :  { %150 = vmatpush3.msra.mxu0 %v29_v3  ;;  %v16_v16 = vld [vmem:[%s290_s1] sm:$0xff] }
   0x7   :  { %151 = vmatprep.subr.mxu0 %v207_v1  ;;  %v15_v17 = vld [vmem:[%s289_s0] sm:$0xff] }
   0x8   :  { %152 = vmatpush3.msra.mxu0 %v28_v4  ;;  %v127_v18 = vld [vmem:[%s291_s2] ss:$0 sm:$0xff] }
   0x9   :  { %153 = vmatprep.subr.mxu0 %v207_v1 }
   0xa   :  { %154 = vmatpush3.msra.mxu0 %v27_v5 }
   0xb   :  { %155 = vmatprep.subr.mxu0 %v207_v1 }
   0xc   :  { %156 = vmatpush3.msra.mxu0 %v26_v6 }
   0xd   :  { %157 = vmatprep.subr.mxu0 %v207_v1 }
   0xe   :  { %158 = vmatpush3.msra.mxu0 %v25_v7 }
   0xf   :  { %159 = vmatprep.subr.mxu0 %v207_v1 }
  0x10   :  { %160 = vmatpush3.msra.mxu0 %v24_v8 }
  0x11   :  { %161 = vmatprep.subr.mxu0 %v207_v1 }
  0x12   :  { %162 = vmatpush3.msra.mxu0 %v23_v9 }
  0x13   :  { %163 = vmatprep.subr.mxu0 %v207_v1 }
  0x14   :  { %164 = vmatpush3.msra.mxu0 %v22_v10 }
  0x15   :  { %165 = vmatprep.subr.mxu0 %v207_v1 }
  0x16   :  { %166 = vmatpush3.msra.mxu0 %v21_v11 }
  0x17   :  { %167 = vmatprep.subr.mxu0 %v207_v1 }
  0x18   :  { %168 = vmatpush3.msra.mxu0 %v20_v12 }
  0x19   :  { %169 = vmatprep.subr.mxu0 %v207_v1 }
  0x1a   :  { %170 = vmatpush3.msra.mxu0 %v19_v13 }
  0x1b   :  { %171 = vmatprep.subr.mxu0 %v207_v1 }
  0x1c   :  { %172 = vmatpush3.msra.mxu0 %v18_v14 }
  0x1d   :  { %173 = vmatprep.subr.mxu0 %v207_v1 }
  0x1e   :  { %174 = vmatpush3.msra.mxu0 %v17_v15 }
  0x1f   :  { %175 = vmatprep.subr.mxu0 %v207_v1 }
  0x20   :  { %176 = vmatpush3.msra.mxu0 %v16_v16 }
  0x21   :  { %178 = vmatmul.mubr.f32.vlgmr.msra.gmra.mxu0 %v15_v17 }
  0xe1   :  { %v105_v19 = vpop.f32.mrf.mxu0 }
  0xe2   :  { %v106_v20 = vadd.f32 %v127_v18, %v105_v19 }
  0xe3   :  { %v179_v21 = vpop.f32.mrf.mxu0 }
  0xe4   :  { %110 = vst.msk [vmem:[#allocation2] sm:$0xff] %vm109_vm1, %v106_v20 }
  0xe5   :  { %115 = vsyncadd [#allocation3], 64  ;;  %s209_s21 = smov [#allocation2]  }
  0xe6   :  { %s116_s1 = sshll.u32 %s209_s21, 4  ;;  %s117_s1 = int_to_ptr.vmem [resolvable:$true] %s116_s1 }
  0xe7   :  { %s185_s22 = scalar_lea.vmem %s117_s1, 64  ;;  %s189_s23 = scalar_lea.vmem %s117_s1, 128 }
  0xe8   :  { %p186_p0 = scmp.ne.s32.totalorder %s117_s1, %s185_s22  ;;  %p190_p1 = scmp.lt.s32.totalorder %s117_s1, %s117_s1 }
  0xe9   :  { %p191_p2 = scmp.lt.s32.totalorder %s189_s23, %s185_s22 }
  0xeb   :  { %p192_p3 = por %p191_p2, %p190_p1 }
  0xed   :  { %p193_p4 = pnand %p192_p3, %p186_p0 }
  0xef   :  { %196 = shalt.err (!%p193_p4)
}
  0xf0   :  { %s210_s0 = smov 64   ;;  %s211_s24 = smov 4  }
  0xf1   :  { %122 = dma.vmem_to_hbm [thread:$0]  %s117_s1, 64, %s292_s3, [#allocation3], %s210_s0, %s210_s0, %s211_s24  }
  0xf2   :  { %205 = dma.done.wait [#allocation3], 128  }
  0xf3   :  { %206 = vsyncadd [#allocation3], 4294967168 }
  0xf4   :  { %126 = vsyncpa [#allocation3], 1 }

</bundles_post_ra>
